<compile_context>
chip_gen: v7x
topology: tpu7x:2x2x1
jax: 0.10.0
libtpu: 0.0.40
codegen_flags: <defaults>
</compile_context>

<pallas_src>
import functools

import jax
import jax.numpy as jnp
from jax.experimental import pallas as pl
from jax.experimental.pallas import tpu as pltpu


def _round_up(x: int, m: int) -> int:
    return ((x + m - 1) // m) * m


def _tpu_defaults():
    """Generation-specific tiling / VMEM defaults."""
    kind = ""
    try:
        kind = jax.devices()[0].device_kind.lower()
    except Exception:  # pragma: no cover - defensive
        pass
    if "v7" in kind:
        # 64 MiB physical VMEM: smaller inter tile, tighter scoped limit.
        return dict(token_tile=384, inter_tile=128,
                    vmem_limit_bytes=48 * 1024 * 1024)
    if "v5 lite" in kind or "v5e" in kind or "v5litepod" in kind:
        # HBM-bound generation; tm ~256 is the balance point.
        return dict(token_tile=256, inter_tile=256,
                    vmem_limit_bytes=96 * 1024 * 1024)
    # v6e (and default): raise token tile toward the MXU roofline.
    return dict(token_tile=512, inter_tile=256,
                vmem_limit_bytes=96 * 1024 * 1024)


def _expert_kernel(x_ref, wgu_ref, wd_ref, o_ref, acc_ref, *, tn):
    # x_ref:   (Tm, dim_p)        token tile (resident across the inter reduction)
    # wgu_ref: (1, dim_p, 2*tn)   fused gate|up weight block (streams over j)
    # wd_ref:  (1, tn, dim_p)     down-proj weight block     (streams over j)
    # o_ref:   (Tm, dim_p)        output tile (written once, on the last j)
    # acc_ref: (Tm, dim_p)        f32 accumulator scratch
    j = pl.program_id(1)

    x = x_ref[...]
    # Single fused MXU pass for gate+up; f32 accumulation.
    gu = jnp.dot(x, wgu_ref[0], preferred_element_type=jnp.float32)
    gate = gu[:, :tn]
    up = gu[:, tn:]

    # SwiGLU activation in f32 (sigmoid runs on the EUP slot).
    hidden = (gate * jax.nn.sigmoid(gate)) * up

    # Down projection of this inter slice; cast operand back to the input dtype
    # so the MXU stays on the fast path when inputs are bf16.
    partial = jnp.dot(hidden.astype(x.dtype), wd_ref[0],
                      preferred_element_type=jnp.float32)

    # Direct write on j==0 (no zero + read-modify-write pass), accumulate after.
    @pl.when(j == 0)
    def _():
        acc_ref[...] = partial

    @pl.when(j > 0)
    def _():
        acc_ref[...] += partial

    @pl.when(j == pl.num_programs(1) - 1)
    def _():
        o_ref[...] = acc_ref[...].astype(o_ref.dtype)


def make_deepseek_expert(wg, wu, wd, *, token_tile=None, inter_tile=None,
                         vmem_limit_bytes=None):
    """Pack the expert weights once and return an `apply(x)` closure.

    wg, wu: [dim, inter]   (transpose of PyTorch nn.Linear weights)
    wd:     [inter, dim]
    """
    defaults = _tpu_defaults()
    token_tile = defaults["token_tile"] if token_tile is None else token_tile
    inter_tile = defaults["inter_tile"] if inter_tile is None else inter_tile
    vmem_limit_bytes = (defaults["vmem_limit_bytes"]
                        if vmem_limit_bytes is None else vmem_limit_bytes)

    dim, inter = wg.shape
    assert wg.shape == (dim, inter)
    assert wu.shape == (dim, inter)
    assert wd.shape == (inter, dim)

    # Lane-dense padding of the feature dims (no-op for real DeepSeek shapes).
    dim_p = _round_up(dim, 128)
    inter_p = _round_up(inter, 128)
    tn = min(_round_up(inter_tile, 128), inter_p)
    inter_p = _round_up(inter_p, tn)
    n_j = inter_p // tn

    wg_p = jnp.pad(wg, ((0, dim_p - dim), (0, inter_p - inter)))
    wu_p = jnp.pad(wu, ((0, dim_p - dim), (0, inter_p - inter)))
    wd_p = jnp.pad(wd, ((0, inter_p - inter), (0, dim_p - dim)))

    # Fused gate|up, block-major over the inter axis: (n_j, dim_p, 2*tn).
    wgu = jnp.concatenate(
        [wg_p.reshape(dim_p, n_j, tn).transpose(1, 0, 2),
         wu_p.reshape(dim_p, n_j, tn).transpose(1, 0, 2)], axis=-1)
    # Down-proj, block-major over the inter axis: (n_j, tn, dim_p).
    wd_b = wd_p.reshape(n_j, tn, dim_p)

    wgu = jax.block_until_ready(wgu)
    wd_b = jax.block_until_ready(wd_b)

    w_itemsize = jnp.dtype(wg.dtype).itemsize
    weight_bytes = (wgu.size + wd_b.size) * w_itemsize

    kernel = functools.partial(_expert_kernel, tn=tn)

    def apply(x):
        orig_shape = x.shape
        assert orig_shape[-1] == dim
        x2 = x.reshape(-1, dim)
        n_tok = x2.shape[0]

        # Token tile rounded to this dtype's native sublane packing.
        itemsize = jnp.dtype(x.dtype).itemsize
        sub = int(max(8, 32 // itemsize))          # 8 f32 / 16 bf16 / 32 int8
        tm = max(sub, min(_round_up(token_tile, sub), _round_up(n_tok, sub)))
        n_tok_p = _round_up(n_tok, tm)
        grid_i = n_tok_p // tm
        # NOTE: on v7x, if grid_i == 1 for a large batch, splitting the token
        # axis in two keeps both TensorCores busy; left to the caller via
        # token_tile since it trades against the arithmetic-intensity threshold.

        xp = jnp.pad(x2, ((0, n_tok_p - n_tok), (0, dim_p - dim)))

        cost = pl.CostEstimate(
            flops=int(2 * n_tok * dim * inter * 3),        # gate + up + down
            transcendentals=int(n_tok * inter),            # sigmoid
            bytes_accessed=int(grid_i * weight_bytes       # weights re-streamed
                               + 2 * n_tok_p * dim_p * itemsize),  # x + out
        )

        out = pl.pallas_call(
            kernel,
            out_shape=jax.ShapeDtypeStruct((n_tok_p, dim_p), x.dtype),
            grid=(grid_i, n_j),
            in_specs=[
                pl.BlockSpec((tm, dim_p), lambda i, j: (i, 0)),        # x tile
                pl.BlockSpec((1, dim_p, 2 * tn), lambda i, j: (j, 0, 0)),  # gate|up
                pl.BlockSpec((1, tn, dim_p), lambda i, j: (j, 0, 0)),  # down
            ],
            out_specs=pl.BlockSpec((tm, dim_p), lambda i, j: (i, 0)),
            scratch_shapes=[pltpu.VMEM((tm, dim_p), jnp.float32)],
            compiler_params=pltpu.CompilerParams(
                dimension_semantics=("parallel", "arbitrary"),
                vmem_limit_bytes=vmem_limit_bytes),
            cost_estimate=cost,
        )(xp, wgu, wd_b)

        out = out[:n_tok, :dim]
        return out.reshape(orig_shape)

    return apply


def deepseek_expert(x, wg, wu, wd, **kwargs):
    """One-shot convenience wrapper (packs weights per call; prefer
    make_deepseek_expert() in a real model so packing happens once)."""
    return make_deepseek_expert(wg, wu, wd, **kwargs)(x)


def _reference(x, wg, wu, wd):
    g = x @ wg
    u = x @ wu
    h = (g * jax.nn.sigmoid(g)) * u
    return h @ wd


if __name__ == "__main__":
    batch, seq, dim, inter = 2, 8, 32, 64

    key = jax.random.PRNGKey(0)
    kx, kg, ku, kd = jax.random.split(key, 4)

    x = jax.random.normal(kx, (batch, seq, dim), dtype=jnp.float32)
    # nn.Linear(dim, inter) weight is (inter, dim) in PyTorch; we store the
    # transpose [dim, inter] so the kernel computes x @ W directly.
    scale_in = 1.0 / jnp.sqrt(dim)
    scale_mid = 1.0 / jnp.sqrt(inter)
    wg = jax.random.uniform(kg, (dim, inter), jnp.float32, -scale_in, scale_in)
    wu = jax.random.uniform(ku, (dim, inter), jnp.float32, -scale_in, scale_in)
    wd = jax.random.uniform(kd, (inter, dim), jnp.float32, -scale_mid, scale_mid)

    expert = make_deepseek_expert(wg, wu, wd)
    out = expert(x)
    jax.block_until_ready(out)

    ref = _reference(x, wg, wu, wd)
    assert out.shape == (batch, seq, dim)
    assert jnp.allclose(out, ref, atol=1e-5, rtol=1e-5)

    print("KERNEL_OK")
</pallas_src>

<mosaic_0001>
module attributes {stable_mosaic.version = 11 : i64} {
  func.func @_expert_kernel(%arg0: i32, %arg1: i32, %arg2: memref<16x128xf32, #tpu.memory_space<vmem>>, %arg3: memref<1x128x256xf32, #tpu.memory_space<vmem>>, %arg4: memref<1x128x128xf32, #tpu.memory_space<vmem>>, %arg5: memref<16x128xf32, #tpu.memory_space<vmem>>, %arg6: memref<16x128xf32, #tpu.memory_space<vmem>>) attributes {dimension_semantics = [#tpu.dimension_semantics<parallel>, #tpu.dimension_semantics<arbitrary>], iteration_bounds = array<i64: 1, 1>, scalar_prefetch = 0 : i64, scratch_operands = 1 : i64, tpu.core_type = #tpu.core_type<tc>, window_params = [{transform_indices = @transform_0, window_bounds = array<i64: 16, 128>}, {transform_indices = @transform_1, window_bounds = array<i64: 1, 128, 256>}, {transform_indices = @transform_2, window_bounds = array<i64: 1, 128, 128>}, {transform_indices = @transform_3, window_bounds = array<i64: 16, 128>}]} {
    %c0 = arith.constant 0 : index
    %c0_0 = arith.constant 0 : index
    %0 = vector.load %arg2[%c0, %c0_0] : memref<16x128xf32, #tpu.memory_space<vmem>>, vector<16x128xf32>
    %c0_1 = arith.constant 0 : index
    %c0_2 = arith.constant 0 : index
    %c0_3 = arith.constant 0 : index
    %1 = vector.load %arg3[%c0_1, %c0_2, %c0_3] : memref<1x128x256xf32, #tpu.memory_space<vmem>>, vector<1x128x256xf32>
    %2 = vector.shape_cast %1 : vector<1x128x256xf32> to vector<128x256xf32>
    %cst = arith.constant dense<0.000000e+00> : vector<16x256xf32>
    %3 = tpu.matmul %0, %2, %cst {dimension_numbers = #tpu.dot_dimension_numbers<[1], [0], [0], [1], [0, 0, 1, 1], [], []>} : vector<16x128xf32>, vector<128x256xf32>, vector<16x256xf32> -> vector<16x256xf32>
    %4 = vector.extract_strided_slice %3 {offsets = [0, 0], sizes = [16, 128], strides = [1, 1]} : vector<16x256xf32> to vector<16x128xf32>
    %5 = vector.extract_strided_slice %3 {offsets = [0, 128], sizes = [16, 128], strides = [1, 1]} : vector<16x256xf32> to vector<16x128xf32>
    %6 = arith.negf %4 : vector<16x128xf32>
    %7 = math.exp %6 : vector<16x128xf32>
    %cst_4 = arith.constant 1.000000e+00 : f32
    %8 = vector.broadcast %cst_4 : f32 to vector<16x128xf32>
    %9 = arith.addf %8, %7 : vector<16x128xf32>
    %10 = arith.divf %8, %9 : vector<16x128xf32>
    %11 = arith.mulf %4, %10 : vector<16x128xf32>
    %12 = arith.mulf %11, %5 : vector<16x128xf32>
    %c0_5 = arith.constant 0 : index
    %c0_6 = arith.constant 0 : index
    %c0_7 = arith.constant 0 : index
    %13 = vector.load %arg4[%c0_5, %c0_6, %c0_7] : memref<1x128x128xf32, #tpu.memory_space<vmem>>, vector<1x128x128xf32>
    %14 = vector.shape_cast %13 : vector<1x128x128xf32> to vector<128x128xf32>
    %cst_8 = arith.constant dense<0.000000e+00> : vector<16x128xf32>
    %15 = tpu.matmul %12, %14, %cst_8 {dimension_numbers = #tpu.dot_dimension_numbers<[1], [0], [0], [1], [0, 0, 1, 1], [], []>} : vector<16x128xf32>, vector<128x128xf32>, vector<16x128xf32> -> vector<16x128xf32>
    %c0_i32 = arith.constant 0 : i32
    %16 = arith.cmpi eq, %arg1, %c0_i32 : i32
    %17 = arith.extui %16 : i1 to i32
    %c0_i32_9 = arith.constant 0 : i32
    %18 = arith.cmpi ne, %17, %c0_i32_9 : i32
    scf.if %18 {
      %c0_14 = arith.constant 0 : index
      %c0_15 = arith.constant 0 : index
      %25 = vector.load %arg6[%c0_14, %c0_15] : memref<16x128xf32, #tpu.memory_space<vmem>>, vector<16x128xf32>
      tpu.vector_store %arg6[%c0_14, %c0_15], %15 {strides = array<i32>} : memref<16x128xf32, #tpu.memory_space<vmem>>, vector<16x128xf32>,
    } else {
    }
    %c0_i32_10 = arith.constant 0 : i32
    %19 = arith.cmpi sgt, %arg1, %c0_i32_10 : i32
    %20 = arith.extui %19 : i1 to i32
    %c0_i32_11 = arith.constant 0 : i32
    %21 = arith.cmpi ne, %20, %c0_i32_11 : i32
    scf.if %21 {
      %c0_14 = arith.constant 0 : index
      %c0_15 = arith.constant 0 : index
      %25 = vector.load %arg6[%c0_14, %c0_15] : memref<16x128xf32, #tpu.memory_space<vmem>>, vector<16x128xf32>
      %26 = arith.addf %25, %15 : vector<16x128xf32>
      %c0_16 = arith.constant 0 : index
      %c0_17 = arith.constant 0 : index
      %27 = vector.load %arg6[%c0_16, %c0_17] : memref<16x128xf32, #tpu.memory_space<vmem>>, vector<16x128xf32>
      tpu.vector_store %arg6[%c0_16, %c0_17], %26 {strides = array<i32>} : memref<16x128xf32, #tpu.memory_space<vmem>>, vector<16x128xf32>,
    } else {
    }
    %c0_i32_12 = arith.constant 0 : i32
    %22 = arith.cmpi eq, %arg1, %c0_i32_12 : i32
    %23 = arith.extui %22 : i1 to i32
    %c0_i32_13 = arith.constant 0 : i32
    %24 = arith.cmpi ne, %23, %c0_i32_13 : i32
    scf.if %24 {
      %c0_14 = arith.constant 0 : index
      %c0_15 = arith.constant 0 : index
      %25 = vector.load %arg6[%c0_14, %c0_15] : memref<16x128xf32, #tpu.memory_space<vmem>>, vector<16x128xf32>
      %c0_16 = arith.constant 0 : index
      %c0_17 = arith.constant 0 : index
      %26 = vector.load %arg5[%c0_16, %c0_17] : memref<16x128xf32, #tpu.memory_space<vmem>>, vector<16x128xf32>
      tpu.vector_store %arg5[%c0_16, %c0_17], %25 {strides = array<i32>} : memref<16x128xf32, #tpu.memory_space<vmem>>, vector<16x128xf32>,
    } else {
    }
    return
  }
  func.func @transform_0(%arg0: i32, %arg1: i32) -> (i32, i32) {
    %c0_i32 = arith.constant 0 : i32
    %c0_i32_0 = arith.constant 0 : i32
    return %arg0, %c0_i32 : i32, i32
  }
  func.func @transform_1(%arg0: i32, %arg1: i32) -> (i32, i32, i32) {
    %c0_i32 = arith.constant 0 : i32
    %c0_i32_0 = arith.constant 0 : i32
    %c0_i32_1 = arith.constant 0 : i32
    return %arg1, %c0_i32, %c0_i32_0 : i32, i32, i32
  }
  func.func @transform_2(%arg0: i32, %arg1: i32) -> (i32, i32, i32) {
    %c0_i32 = arith.constant 0 : i32
    %c0_i32_0 = arith.constant 0 : i32
    %c0_i32_1 = arith.constant 0 : i32
    return %arg1, %c0_i32, %c0_i32_0 : i32, i32, i32
  }
  func.func @transform_3(%arg0: i32, %arg1: i32) -> (i32, i32) {
    %c0_i32 = arith.constant 0 : i32
    %c0_i32_0 = arith.constant 0 : i32
    return %arg0, %c0_i32 : i32, i32
  }
}

</mosaic_0001>

<bundles_post_ra>
// kernel: tpu_custom_call.1
= control target key start
LH: loop header
LB: loop body
LE: loop exit
PB: predicated region body
PF: predicated region fallthrough
CT: control target
= control target key end

     0   :  { %8 = vsyncpa [#allocation4], 0  ;;  %s633_s0 = inlined_call_operand.hbm [shape: f32[16,128], index: 0, kind: input, shape index: {}]   ;;  %s634_s1 = inlined_call_operand.hbm [shape: f32[1,128,256], index: 1, kind: input, shape index: {}]   ;;  %s635_s2 = inlined_call_operand.hbm [shape: f32[1,128,128], index: 2, kind: input, shape index: {}]   ;;  %s636_s3 = inlined_call_operand.hbm [shape: f32[16,128], index: 3, kind: output, shape index: {}]  }
   0x1   :  { %9 = vsyncpa [#allocation7], 0 }
   0x2   :  { %10 = vsyncpa [#allocation5], 0  ;;  %s545_s12 = smov [#allocation6]   ;;  %s451_s16 = scalar_lea.hbm %s634_s1, 4096 }
   0x3   :  { %s28_s13 = sshll.u32 %s545_s12, 4  ;;  %p452_p0 = scmp.ne.s32.totalorder %s634_s1, %s451_s16  ;;  %s29_s13 = int_to_ptr.vmem [resolvable:$true] %s28_s13 }
   0x4   :  { %p455_p1 = scmp.lt.u32.totalorder %s451_s16, %s634_s1 }
   0x6   :  { %p457_p2 = pnand %p455_p1, %p452_p0 }
   0x8   :  { %460 = shalt.err (!%p457_p2)
}
   0x9   :  { %s461_s21 = scalar_lea.vmem %s29_s13, 4096  ;;  %p466_p4 = scmp.lt.s32.totalorder %s29_s13, %s29_s13 }
   0xa   :  { %p462_p3 = scmp.ne.s32.totalorder %s29_s13, %s461_s21  ;;  %p467_p5 = scmp.lt.s32.totalorder %s461_s21, %s461_s21 }
   0xc   :  { %p468_p6 = por %p467_p5, %p466_p4 }
   0xe   :  { %p469_p7 = pnand %p468_p6, %p462_p3 }
  0x10   :  { %472 = shalt.err (!%p469_p7)
}
  0x11   :  { %s546_s22 = smov 256   ;;  %s547_s23 = smov 16  }
  0x12   :  { %34 = dma.hbm_to_vmem [thread:$0]  %s634_s1, 4096, %s29_s13, [#allocation7], %s546_s22, %s546_s22, %s547_s23  }
  0x13   :  { %s548_s26 = smov [#allocation3]   ;;  %s473_s30 = scalar_lea.hbm %s633_s0, 256 }
  0x14   :  { %s16_s27 = sshll.u32 %s548_s26, 4  ;;  %p474_p8 = scmp.ne.s32.totalorder %s633_s0, %s473_s30  ;;  %s17_s27 = int_to_ptr.vmem [resolvable:$true] %s16_s27 }
  0x15   :  { %p477_p9 = scmp.lt.u32.totalorder %s473_s30, %s633_s0 }
  0x17   :  { %p479_p10 = pnand %p477_p9, %p474_p8 }
  0x19   :  { %482 = shalt.err (!%p479_p10)
}
  0x1a   :  { %s483_s8 = scalar_lea.vmem %s17_s27, 256  ;;  %p488_p12 = scmp.lt.s32.totalorder %s17_s27, %s17_s27 }
  0x1b   :  { %p484_p11 = scmp.ne.s32.totalorder %s17_s27, %s483_s8  ;;  %p489_p13 = scmp.lt.s32.totalorder %s483_s8, %s483_s8 }
  0x1d   :  { %p490_p0 = por %p489_p13, %p488_p12 }
  0x1f   :  { %p491_p1 = pnand %p490_p0, %p484_p11 }
  0x21   :  { %494 = shalt.err (!%p491_p1)
}
  0x22   :  { %s549_s1 = smov 128   ;;  %s550_s9 = smov 8  }
  0x23   :  { %22 = dma.hbm_to_vmem [thread:$0]  %s633_s0, 256, %s17_s27, [#allocation4], %s549_s1, %s549_s1, %s550_s9  }
  0x24   :  { %s551_s12 = smov [#allocation8]   ;;  %s495_s16 = scalar_lea.hbm %s635_s2, 2048 }
  0x25   :  { %s40_s13 = sshll.u32 %s551_s12, 4  ;;  %p496_p2 = scmp.ne.s32.totalorder %s635_s2, %s495_s16  ;;  %s41_s13 = int_to_ptr.vmem [resolvable:$true] %s40_s13 }
  0x26   :  { %p499_p3 = scmp.lt.u32.totalorder %s495_s16, %s635_s2 }
  0x28   :  { %p501_p4 = pnand %p499_p3, %p496_p2 }
  0x2a   :  { %504 = shalt.err (!%p501_p4)
}
  0x2b   :  { %s505_s21 = scalar_lea.vmem %s41_s13, 2048  ;;  %p510_p6 = scmp.lt.s32.totalorder %s41_s13, %s41_s13 }
  0x2c   :  { %p506_p5 = scmp.ne.s32.totalorder %s41_s13, %s505_s21  ;;  %p511_p7 = scmp.lt.s32.totalorder %s505_s21, %s505_s21 }
  0x2e   :  { %p512_p8 = por %p511_p7, %p510_p6 }
  0x30   :  { %p513_p9 = pnand %p512_p8, %p506_p5 }
  0x32   :  { %516 = shalt.err (!%p513_p9)
}
  0x33   :  { %46 = dma.hbm_to_vmem [thread:$0]  %s635_s2, 2048, %s41_s13, [#allocation7], %s549_s1, %s549_s1, %s550_s9  }
  0x34   :  { %539 = dma.done.wait [#allocation4], 256  }
  0x35   :  { %540 = vsyncadd [#allocation4], 4294967040 }
  0x36   :  { %541 = dma.done.wait [#allocation7], 6144  }
  0x37   :  { %542 = vsyncadd [#allocation7], 4294961152  ;;  %v552_v0 = vmov 0.0   ;;  %v59_v1 = vld [vmem:[#allocation6 + $0x8] sm:$0xff]  ;;  %v61_v2 = vld [vmem:[#allocation6 + $0x18] sm:$0xff]  ;;  %s553_s2 = smov [#allocation9]  }
  0x38   :  { %154 = vmatprep.mubr.f32.mxu0 %v552_v0  ;;  %v58_v3 = vld [vmem:[#allocation6] sm:$0xff]  ;;  %v370_v4 = vpack.c.bf16 %v61_v2, %v59_v1  ;;  %v60_v5 = vld [vmem:[#allocation6 + $0x10] sm:$0xff]  ;;  %v63_v6 = vld [vmem:[#allocation6 + $0x28] sm:$0xff]  ;;  %s302_s23 = sshll.u32 %s553_s2, 4  ;;  %s303_s23 = int_to_ptr.vmem [resolvable:$true] %s302_s23 }
  0x39   :  { %v65_v7 = vld [vmem:[#allocation6 + $0x38] sm:$0xff]  ;;  %v372_v8 = vpack.c.bf16 %v60_v5, %v58_v3  ;;  %v62_v10 = vld [vmem:[#allocation6 + $0x20] sm:$0xff]  ;;  %v64_v11 = vld [vmem:[#allocation6 + $0x30] sm:$0xff]  ;;  %s517_s24 = scalar_lea.vmem %s303_s23, 256  ;;  %p522_p11 = scmp.lt.s32.totalorder %s303_s23, %s303_s23 }
  0x3a   :  { %v374_v9 = vpack.c.bf16 %v65_v7, %v63_v6  ;;  %v67_v12 = vld [vmem:[#allocation6 + $0x48] sm:$0xff]  ;;  %371 = vmatprep.subr.bf16.mxu0 %v370_v4  ;;  %v69_v13 = vld [vmem:[#allocation6 + $0x58] sm:$0xff]  ;;  %v376_v14 = vpack.c.bf16 %v64_v11, %v62_v10  ;;  %v66_v16 = vld [vmem:[#allocation6 + $0x40] sm:$0xff]  ;;  %p518_p10 = scmp.ne.s32.totalorder %s303_s23, %s517_s24  ;;  %p523_p12 = scmp.lt.s32.totalorder %s517_s24, %s517_s24 }
  0x3b   :  { %373 = vmatpush1.bf16.msra.mxu0 %v372_v8  ;;  %v378_v15 = vpack.c.bf16 %v69_v13, %v67_v12  ;;  %v68_v17 = vld [vmem:[#allocation6 + $0x50] sm:$0xff]  ;;  %v71_v18 = vld [vmem:[#allocation6 + $0x68] sm:$0xff]  ;;  %v73_v19 = vld [vmem:[#allocation6 + $0x78] sm:$0xff] }
  0x3c   :  { %375 = vmatprep.subr.bf16.mxu0 %v374_v9  ;;  %v380_v20 = vpack.c.bf16 %v68_v17, %v66_v16  ;;  %v382_v21 = vpack.c.bf16 %v73_v19, %v71_v18  ;;  %v70_v22 = vld [vmem:[#allocation6 + $0x60] sm:$0xff]  ;;  %v72_v23 = vld [vmem:[#allocation6 + $0x70] sm:$0xff]  ;;  %v75_v24 = vld [vmem:[#allocation6 + $0x88] sm:$0xff]  ;;  %p524_p13 = por %p523_p12, %p522_p11 }
  0x3d   :  { %v77_v25 = vld [vmem:[#allocation6 + $0x98] sm:$0xff]  ;;  %v384_v26 = vpack.c.bf16 %v72_v23, %v70_v22  ;;  %v74_v28 = vld [vmem:[#allocation6 + $0x80] sm:$0xff]  ;;  %v76_v29 = vld [vmem:[#allocation6 + $0x90] sm:$0xff] }
  0x3e   :  { %v386_v27 = vpack.c.bf16 %v77_v25, %v75_v24  ;;  %v79_v30 = vld [vmem:[#allocation6 + $0xa8] sm:$0xff]  ;;  %v81_v31 = vld [vmem:[#allocation6 + $0xb8] sm:$0xff]  ;;  %v388_v32 = vpack.c.bf16 %v76_v29, %v74_v28  ;;  %v78_v34 = vld [vmem:[#allocation6 + $0xa0] sm:$0xff]  ;;  %p525_p0 = pnand %p524_p13, %p518_p10 }
  0x3f   :  { %377 = vmatpush1.bf16.msra.mxu0 %v376_v14  ;;  %v390_v33 = vpack.c.bf16 %v81_v31, %v79_v30  ;;  %v80_v35 = vld [vmem:[#allocation6 + $0xb0] sm:$0xff]  ;;  %v83_v36 = vld [vmem:[#allocation6 + $0xc8] sm:$0xff]  ;;  %v85_v37 = vld [vmem:[#allocation6 + $0xd8] sm:$0xff] }
  0x40   :  { %379 = vmatprep.subr.bf16.mxu0 %v378_v15  ;;  %v392_v38 = vpack.c.bf16 %v80_v35, %v78_v34  ;;  %v394_v39 = vpack.c.bf16 %v85_v37, %v83_v36  ;;  %v82_v40 = vld [vmem:[#allocation6 + $0xc0] sm:$0xff]  ;;  %v84_v41 = vld [vmem:[#allocation6 + $0xd0] sm:$0xff]  ;;  %v87_v42 = vld [vmem:[#allocation6 + $0xe8] sm:$0xff] }
  0x41   :  { %v89_v43 = vld [vmem:[#allocation6 + $0xf8] sm:$0xff]  ;;  %v396_v44 = vpack.c.bf16 %v84_v41, %v82_v40  ;;  %v86_v46 = vld [vmem:[#allocation6 + $0xe0] sm:$0xff]  ;;  %v88_v47 = vld [vmem:[#allocation6 + $0xf0] sm:$0xff] }
  0x42   :  { %v398_v45 = vpack.c.bf16 %v89_v43, %v87_v42  ;;  %v400_v48 = vpack.c.bf16 %v88_v47, %v86_v46  ;;  %v56_v49 = vld [vmem:[#allocation3] sm:$0xff]  ;;  %v57_v50 = vld [vmem:[#allocation3 + $0x8] sm:$0xff]  ;;  %v183_v51 = vld [vmem:[#allocation8] sm:$0xff] }
  0x43   :  { %381 = vmatpush1.bf16.msra.mxu0 %v380_v20  ;;  %v184_v52 = vld [vmem:[#allocation8 + $0x8] sm:$0xff]  ;;  %v185_v54 = vld [vmem:[#allocation8 + $0x10] sm:$0xff]  ;;  %v186_v55 = vld [vmem:[#allocation8 + $0x18] sm:$0xff] }
  0x44   :  { %383 = vmatprep.subr.bf16.mxu0 %v382_v21  ;;  %v402_v53 = vpack.c.bf16 %v184_v52, %v183_v51  ;;  %v406_v56 = vpack.c.bf16 %v186_v55, %v185_v54  ;;  %v187_v57 = vld [vmem:[#allocation8 + $0x20] sm:$0xff]  ;;  %v188_v58 = vld [vmem:[#allocation8 + $0x28] sm:$0xff]  ;;  %v189_v60 = vld [vmem:[#allocation8 + $0x30] sm:$0xff] }
  0x45   :  { %v410_v59 = vpack.c.bf16 %v188_v58, %v187_v57  ;;  %v190_v61 = vld [vmem:[#allocation8 + $0x38] sm:$0xff]  ;;  %v191_v63 = vld [vmem:[#allocation8 + $0x40] sm:$0xff]  ;;  %v193_v2 = vld [vmem:[#allocation8 + $0x50] sm:$0xff] }
  0x46   :  { %403 = vmatprep.subr.bf16.mxu1 %v402_v53  ;;  %v414_v62 = vpack.c.bf16 %v190_v61, %v189_v60  ;;  %v194_v3 = vld [vmem:[#allocation8 + $0x58] sm:$0xff]  ;;  %v195_v5 = vld [vmem:[#allocation8 + $0x60] sm:$0xff]  ;;  %v196_v6 = vld [vmem:[#allocation8 + $0x68] sm:$0xff] }
  0x47   :  { %385 = vmatpush1.bf16.msra.mxu0 %v384_v26  ;;  %405 = vmatpush3.bf16.msra.mxu1 %v402_v53  ;;  %v422_v4 = vpack.c.bf16 %v194_v3, %v193_v2  ;;  %v426_v7 = vpack.c.bf16 %v196_v6, %v195_v5  ;;  %v197_v8 = vld [vmem:[#allocation8 + $0x70] sm:$0xff]  ;;  %v198_v9 = vld [vmem:[#allocation8 + $0x78] sm:$0xff] }
  0x48   :  { %387 = vmatprep.subr.bf16.mxu0 %v386_v27  ;;  %407 = vmatprep.subr.bf16.mxu1 %v406_v56  ;;  %v430_v10 = vpack.c.bf16 %v198_v9, %v197_v8 }
  0x4b   :  { %389 = vmatpush1.bf16.msra.mxu0 %v388_v32  ;;  %409 = vmatpush3.bf16.msra.mxu1 %v406_v56 }
  0x4c   :  { %391 = vmatprep.subr.bf16.mxu0 %v390_v33  ;;  %411 = vmatprep.subr.bf16.mxu1 %v410_v59 }
  0x4f   :  { %393 = vmatpush1.bf16.msra.mxu0 %v392_v38  ;;  %413 = vmatpush3.bf16.msra.mxu1 %v410_v59 }
  0x50   :  { %395 = vmatprep.subr.bf16.mxu0 %v394_v39  ;;  %415 = vmatprep.subr.bf16.mxu1 %v414_v62 }
  0x53   :  { %397 = vmatpush1.bf16.msra.mxu0 %v396_v44  ;;  %417 = vmatpush3.bf16.msra.mxu1 %v414_v62 }
  0x54   :  { %399 = vmatprep.subr.bf16.mxu0 %v398_v45 }
  0x57   :  { %401 = vmatpush1.bf16.msra.mxu0 %v400_v48 }
  0x5a   :  { %155 = vmatmul.mubr.f32.vlgmr.msra.gmra.mrb[0].mxu0 %v56_v49 }
  0x5b   :  { %160 = vmatprep.mubr.f32.mxu0 %v552_v0  ;;  %v192_v0 = vld [vmem:[#allocation8 + $0x48] sm:$0xff] }
  0x5c   :  { %v418_v1 = vpack.c.bf16 %v192_v0, %v191_v63 }
  0x5e   :  { %161 = vmatmul.mubr.f32.gmra.mrb[2].mxu0 %v57_v50  ;;  %419 = vmatprep.subr.bf16.mxu1 %v418_v1 }
  0x5f   :  { %421 = vmatpush3.bf16.msra.mxu1 %v418_v1 }
  0x60   :  { %423 = vmatprep.subr.bf16.mxu1 %v422_v4 }
  0x63   :  { %425 = vmatpush3.bf16.msra.mxu1 %v422_v4 }
  0x64   :  { %427 = vmatprep.subr.bf16.mxu1 %v426_v7 }
  0x67   :  { %429 = vmatpush3.bf16.msra.mxu1 %v426_v7 }
  0x68   :  { %431 = vmatprep.subr.bf16.mxu1 %v430_v10 }
  0x6b   :  { %433 = vmatpush3.bf16.msra.mxu1 %v430_v10 }
 0x12d   :  { %v156_v11 = vpop.f32.mrb[0].mxu0 }
 0x12e   :  { %v315_v12 = vmul.f32 -1.442695, %v156_v11  ;;  %v158_v13 = vpop.f32.mrb[1].mxu0 }
 0x130   :  { %443 = vpow2.f32 %v315_v12 }
 0x131   :  { %v162_v14 = vpop.f32.mrb[2].mxu0 }
 0x132   :  { %v316_v15 = vmul.f32 -1.442695, %v162_v14  ;;  %v164_v16 = vpop.f32.mrb[3].mxu0 }
 0x134   :  { %445 = vpow2.f32 %v316_v15 }
 0x13a   :  { %v444_v17 = vpop.eup %443 }
 0x13b   :  { %v173_v18 = vadd.f32 1.0, %v444_v17 }
 0x13d   :  { %447 = vrcp.f32 %v173_v18 }
 0x13e   :  { %v446_v19 = vpop.eup %445 }
 0x13f   :  { %v174_v20 = vadd.f32 1.0, %v446_v19 }
 0x141   :  { %449 = vrcp.f32 %v174_v20 }
 0x147   :  { %v448_v21 = vpop.eup %447 }
 0x148   :  { %v179_v22 = vmul.f32 %v448_v21, %v156_v11 }
 0x14a   :  { %v181_v23 = vmul.f32 %v179_v22, %v158_v13 }
 0x14b   :  { %v450_v24 = vpop.eup %449 }
 0x14c   :  { %v180_v25 = vmul.f32 %v450_v24, %v162_v14  ;;  %367 = vmatprep.mubr.f32.mxu1 %v181_v23 }
 0x14e   :  { %v182_v26 = vmul.f32 %v180_v25, %v164_v16 }
 0x150   :  { %368 = vmatmul.mubr.f32.vlgmr.msra.gmra.mrb[0].mxu1 %v182_v26 }
 0x223   :  { %v369_v27 = vpop.f32.mrb[0].mxu1 }
 0x224   :  { %296 = vst [vmem:[#allocation9 + $0x8] sm:$0xff] %v369_v27  ;;  %v265_v28 = vpop.f32.mrb[1].mxu1 }
 0x225   :  { %295 = vst [vmem:[#allocation9] sm:$0xff] %v265_v28 }
 0x226   :  { %528 = shalt.err (!%p525_p0)
}
 0x227   :  { %s529_s27 = scalar_lea.hbm %s636_s3, 256 }
 0x228   :  { %p530_p1 = scmp.ne.s32.totalorder %s636_s3, %s529_s27  ;;  %p533_p2 = scmp.lt.u32.totalorder %s529_s27, %s636_s3 }
 0x22a   :  { %p535_p3 = pnand %p533_p2, %p530_p1 }
 0x22c   :  { %538 = shalt.err (!%p535_p3)
}
 0x22d   :  { %308 = dma.vmem_to_hbm [thread:$0]  %s303_s23, 256, %s636_s3, [#allocation5], %s549_s1, %s549_s1, %s550_s9  }
 0x22e   :  { %543 = dma.done.wait [#allocation5], 256  }
 0x22f   :  { %544 = vsyncadd [#allocation5], 4294967040 }
 0x230   :  { %312 = vsyncpa [#allocation4], 1 }
 0x231   :  { %313 = vsyncpa [#allocation7], 1 }
 0x232   :  { %314 = vsyncpa [#allocation5], 1 }

</bundles_post_ra>
